<compile_context>
chip_gen: v7x
topology: tpu7x:2x2x1
jax: 0.10.0
libtpu: 0.0.40
codegen_flags: <defaults>
</compile_context>

<pallas_src>
import jax
import jax.numpy as jnp
from jax.experimental import pallas as pl
from jax.experimental.pallas import tpu as pltpu

_LANE = 128      # TPU vreg lane width
_SUBLANE = 8     # TPU vreg sublane width (f32)


def _round_up(n, m):
    return ((n + m - 1) // m) * m


def dqn_kernel(x_ref, w1_ref, b1_ref, w2_ref, b2_ref, w3_ref, b3_ref, out_ref):
    # layer 1: Linear(num_inputs -> 64) + sigmoid.
    # bf16 operands -> MXU fast path; f32 accumulation; f32 element-wise math.
    z1 = jnp.dot(x_ref[...].astype(jnp.bfloat16), w1_ref[...],
                 preferred_element_type=jnp.float32) + b1_ref[...]
    # exp on the EUP, approximate reciprocal also on the EUP (frees VALU slots)
    h1 = pl.reciprocal(1.0 + jnp.exp(-z1), approx=True)

    # layer 2: Linear(64 -> 32) + relu.
    z2 = jnp.dot(h1.astype(jnp.bfloat16), w2_ref[...],
                 preferred_element_type=jnp.float32) + b2_ref[...]
    h2 = jnp.maximum(z2, 0.0)

    # layer 3: Linear(32 -> num_outputs), no activation.
    z3 = jnp.dot(h2.astype(jnp.bfloat16), w3_ref[...],
                 preferred_element_type=jnp.float32) + b3_ref[...]
    out_ref[...] = z3.astype(out_ref.dtype)


def dqn_forward(x, kernel_params, *, block_batch=1024):
    """x: (B, num_inputs) f32 (bf16 also accepted).  kernel_params: see
    prepare_kernel_params (weights (in, out)-layout, hidden dims padded to 128,
    weights bf16 / biases f32)."""
    w1, b1, w2, b2, w3, b3 = (kernel_params[k]
                              for k in ("w1", "b1", "w2", "b2", "w3", "b3"))
    B, num_inputs = x.shape
    assert w1.shape[0] == num_inputs
    num_outputs = w3.shape[1]

    # Batch tile: single grid step for typical replay batches, otherwise the
    # smallest multiple of 8 giving cdiv(B, block_batch) steps.  On v7x pass a
    # smaller block_batch (~B/2) so >=2 parallel steps engage both TensorCores.
    b8 = _round_up(B, _SUBLANE)
    if b8 <= block_batch:
        tb = b8                                   # grid = (1,)
    else:
        n_steps = -(-b8 // block_batch)           # cdiv
        tb = _round_up(-(-b8 // n_steps), _SUBLANE)
    b_pad = _round_up(B, tb)

    # Only pad the batch (no lane padding on x); skip the pad entirely when
    # the batch already fits the tile.
    if b_pad == B:
        x_pad = x
    else:
        x_pad = jnp.zeros((b_pad, num_inputs), x.dtype).at[:B].set(x)

    grid = (b_pad // tb,)

    # VMEM guardrail: double-buffered x/out tiles + resident weights/biases.
    # Keep well under the 32 MiB scoped default (v7x: 64 MiB physical VMEM).
    tile_bytes = x.dtype.itemsize * tb * num_inputs + 4 * tb * num_outputs
    resident_bytes = sum(int(a.nbytes) for a in (w1, b1, w2, b2, w3, b3))
    vmem_est = 2 * tile_bytes + resident_bytes
    assert vmem_est < 24 * 1024 * 1024, (
        f"estimated VMEM footprint {vmem_est} B too large; lower block_batch")

    # Cost estimate reflecting the real (unpadded x/out, bf16 weight) traffic.
    flops = 2 * b_pad * (num_inputs * _LANE + _LANE * _LANE
                         + _LANE * num_outputs)
    bytes_accessed = (x.dtype.itemsize * b_pad * num_inputs     # x read
                      + 4 * b_pad * num_outputs                 # out write
                      + resident_bytes)                         # weights/biases
    cost = pl.CostEstimate(flops=flops,
                           transcendentals=b_pad * _LANE,       # exp in sigmoid
                           bytes_accessed=bytes_accessed)

    # Weights/biases: constant index_map -> DMA'd once, VMEM-resident.
    const = lambda a: pl.BlockSpec(a.shape, lambda i: (0, 0))

    out = pl.pallas_call(
        dqn_kernel,
        out_shape=jax.ShapeDtypeStruct((b_pad, num_outputs), jnp.float32),
        grid=grid,
        in_specs=[
            pl.BlockSpec((tb, num_inputs), lambda i: (i, 0)),   # x: batch-tiled
            const(w1), const(b1),
            const(w2), const(b2),
            const(w3), const(b3),
        ],
        out_specs=pl.BlockSpec((tb, num_outputs), lambda i: (i, 0)),
        compiler_params=pltpu.CompilerParams(
            dimension_semantics=("parallel",)),
        cost_estimate=cost,
    )(x_pad, w1, b1, w2, b2, w3, b3)

    return out[:B] if b_pad != B else out


def init_params(key, num_inputs, num_outputs):
    """Deterministic synthetic init matching nn.Linear (weight: (out, in))."""
    keys = jax.random.split(key, 6)

    def linear(kw, kb, fan_in, fan_out):
        bound = 1.0 / jnp.sqrt(fan_in)
        w = jax.random.uniform(kw, (fan_out, fan_in), jnp.float32, -bound, bound)
        b = jax.random.uniform(kb, (fan_out,), jnp.float32, -bound, bound)
        return w, b

    w1, b1 = linear(keys[0], keys[1], num_inputs, 64)
    w2, b2 = linear(keys[2], keys[3], 64, 32)
    w3, b3 = linear(keys[4], keys[5], 32, num_outputs)
    return {"w1": w1, "b1": b1, "w2": w2, "b2": b2, "w3": w3, "b3": b3}


def prepare_kernel_params(params):
    """(in, out) layout; hidden dims (64/32) zero-padded to 128; weights bf16
    (MXU operands), biases f32.  The pads must stay exactly zero: padded h1
    lanes evaluate sigmoid(0)=0.5 and rely on w2's zero pad rows to stay inert
    (bf16(0) == 0, so the bf16 cast preserves that invariant)."""
    def pad2(a, rows, cols, dtype):
        out = jnp.zeros((rows, cols), jnp.float32)
        out = out.at[: a.shape[0], : a.shape[1]].set(a)
        return out.astype(dtype)

    num_inputs = params["w1"].shape[1]
    num_outputs = params["w3"].shape[0]

    return {
        "w1": pad2(params["w1"].T, num_inputs, _LANE, jnp.bfloat16),
        "b1": pad2(params["b1"].reshape(1, -1), 1, _LANE, jnp.float32),
        "w2": pad2(params["w2"].T, _LANE, _LANE, jnp.bfloat16),
        "b2": pad2(params["b2"].reshape(1, -1), 1, _LANE, jnp.float32),
        "w3": pad2(params["w3"].T, _LANE, num_outputs, jnp.bfloat16),
        "b3": pad2(params["b3"].reshape(1, -1), 1, num_outputs, jnp.float32),
    }


def dqn_reference(x, params):
    """Pure-JAX f32 reference mirroring the PyTorch module exactly."""
    h1 = jax.nn.sigmoid(x @ params["w1"].T + params["b1"])
    h2 = jnp.maximum(h1 @ params["w2"].T + params["b2"], 0.0)
    return h2 @ params["w3"].T + params["b3"]


if __name__ == "__main__":
    key = jax.random.PRNGKey(0)
    k_params, k_x = jax.random.split(key)

    batch, num_inputs, num_outputs = 32, 16, 4
    params = init_params(k_params, num_inputs, num_outputs)
    kparams = prepare_kernel_params(params)
    x = jax.random.normal(k_x, (batch, num_inputs), jnp.float32)

    out = dqn_forward(x, kparams)        # single grid step at this batch size
    out = jax.block_until_ready(out)

    ref = dqn_reference(x, params)
    assert out.shape == (batch, num_outputs)
    # bf16 MXU operands + approx reciprocal: ~1e-2-scale error vs f32 reference.
    err = float(jnp.max(jnp.abs(out - ref)))
    assert jnp.allclose(out, ref, atol=5e-2, rtol=5e-2), err

    print("KERNEL_OK")
</pallas_src>

<mosaic_0001>
module attributes {stable_mosaic.version = 11 : i64} {
  func.func @dqn_kernel(%arg0: i32, %arg1: memref<32x16xf32, #tpu.memory_space<vmem>>, %arg2: memref<16x128xbf16, #tpu.memory_space<vmem>>, %arg3: memref<1x128xf32, #tpu.memory_space<vmem>>, %arg4: memref<128x128xbf16, #tpu.memory_space<vmem>>, %arg5: memref<1x128xf32, #tpu.memory_space<vmem>>, %arg6: memref<128x4xbf16, #tpu.memory_space<vmem>>, %arg7: memref<1x4xf32, #tpu.memory_space<vmem>>, %arg8: memref<32x4xf32, #tpu.memory_space<vmem>>) attributes {dimension_semantics = [#tpu.dimension_semantics<parallel>], iteration_bounds = array<i64: 1>, scalar_prefetch = 0 : i64, scratch_operands = 0 : i64, tpu.core_type = #tpu.core_type<tc>, window_params = [{transform_indices = @transform_0, window_bounds = array<i64: 32, 16>}, {pipeline_mode = #tpu.pipeline_mode<synchronous>, transform_indices = @transform_1, window_bounds = array<i64: 16, 128>}, {pipeline_mode = #tpu.pipeline_mode<synchronous>, transform_indices = @transform_2, window_bounds = array<i64: 1, 128>}, {pipeline_mode = #tpu.pipeline_mode<synchronous>, transform_indices = @transform_3, window_bounds = array<i64: 128, 128>}, {pipeline_mode = #tpu.pipeline_mode<synchronous>, transform_indices = @transform_4, window_bounds = array<i64: 1, 128>}, {pipeline_mode = #tpu.pipeline_mode<synchronous>, transform_indices = @transform_5, window_bounds = array<i64: 128, 4>}, {pipeline_mode = #tpu.pipeline_mode<synchronous>, transform_indices = @transform_6, window_bounds = array<i64: 1, 4>}, {transform_indices = @transform_7, window_bounds = array<i64: 32, 4>}]} {
    %c0 = arith.constant 0 : index
    %c0_0 = arith.constant 0 : index
    %0 = vector.load %arg1[%c0, %c0_0] : memref<32x16xf32, #tpu.memory_space<vmem>>, vector<32x16xf32>
    %1 = arith.truncf %0 : vector<32x16xf32> to vector<32x16xbf16>
    %c0_1 = arith.constant 0 : index
    %c0_2 = arith.constant 0 : index
    %2 = vector.load %arg2[%c0_1, %c0_2] : memref<16x128xbf16, #tpu.memory_space<vmem>>, vector<16x128xbf16>
    %cst = arith.constant dense<0.000000e+00> : vector<32x128xf32>
    %3 = tpu.matmul %1, %2, %cst {dimension_numbers = #tpu.dot_dimension_numbers<[1], [0], [0], [1], [0, 0, 1, 1], [], []>} : vector<32x16xbf16>, vector<16x128xbf16>, vector<32x128xf32> -> vector<32x128xf32>
    %c0_3 = arith.constant 0 : index
    %c0_4 = arith.constant 0 : index
    %4 = vector.load %arg3[%c0_3, %c0_4] : memref<1x128xf32, #tpu.memory_space<vmem>>, vector<1x128xf32>
    %5 = vector.broadcast %4 : vector<1x128xf32> to vector<32x128xf32>
    %6 = arith.addf %3, %5 : vector<32x128xf32>
    %cst_5 = arith.constant 0.000000e+00 : f32
    %7 = vector.broadcast %cst_5 : f32 to vector<32x128xf32>
    %8 = arith.subf %7, %6 : vector<32x128xf32>
    %9 = math.exp %8 : vector<32x128xf32>
    %cst_6 = arith.constant 1.000000e+00 : f32
    %10 = vector.broadcast %cst_6 : f32 to vector<32x128xf32>
    %11 = arith.addf %10, %9 : vector<32x128xf32>
    %12 = tpu.reciprocal %11 {approx = true} : vector<32x128xf32> -> vector<32x128xf32>
    %13 = arith.truncf %12 : vector<32x128xf32> to vector<32x128xbf16>
    %c0_7 = arith.constant 0 : index
    %c0_8 = arith.constant 0 : index
    %14 = vector.load %arg4[%c0_7, %c0_8] : memref<128x128xbf16, #tpu.memory_space<vmem>>, vector<128x128xbf16>
    %cst_9 = arith.constant dense<0.000000e+00> : vector<32x128xf32>
    %15 = tpu.matmul %13, %14, %cst_9 {dimension_numbers = #tpu.dot_dimension_numbers<[1], [0], [0], [1], [0, 0, 1, 1], [], []>} : vector<32x128xbf16>, vector<128x128xbf16>, vector<32x128xf32> -> vector<32x128xf32>
    %c0_10 = arith.constant 0 : index
    %c0_11 = arith.constant 0 : index
    %16 = vector.load %arg5[%c0_10, %c0_11] : memref<1x128xf32, #tpu.memory_space<vmem>>, vector<1x128xf32>
    %17 = vector.broadcast %16 : vector<1x128xf32> to vector<32x128xf32>
    %18 = arith.addf %15, %17 : vector<32x128xf32>
    %cst_12 = arith.constant 0.000000e+00 : f32
    %19 = vector.broadcast %cst_12 : f32 to vector<32x128xf32>
    %20 = arith.maximumf %18, %19 : vector<32x128xf32>
    %21 = arith.truncf %20 : vector<32x128xf32> to vector<32x128xbf16>
    %c0_13 = arith.constant 0 : index
    %c0_14 = arith.constant 0 : index
    %22 = vector.load %arg6[%c0_13, %c0_14] : memref<128x4xbf16, #tpu.memory_space<vmem>>, vector<128x4xbf16>
    %cst_15 = arith.constant dense<0.000000e+00> : vector<32x4xf32>
    %23 = tpu.matmul %21, %22, %cst_15 {dimension_numbers = #tpu.dot_dimension_numbers<[1], [0], [0], [1], [0, 0, 1, 1], [], []>} : vector<32x128xbf16>, vector<128x4xbf16>, vector<32x4xf32> -> vector<32x4xf32>
    %c0_16 = arith.constant 0 : index
    %c0_17 = arith.constant 0 : index
    %24 = vector.load %arg7[%c0_16, %c0_17] : memref<1x4xf32, #tpu.memory_space<vmem>>, vector<1x4xf32>
    %25 = vector.broadcast %24 : vector<1x4xf32> to vector<32x4xf32>
    %26 = arith.addf %23, %25 : vector<32x4xf32>
    %c0_18 = arith.constant 0 : index
    %c0_19 = arith.constant 0 : index
    %27 = vector.load %arg8[%c0_18, %c0_19] : memref<32x4xf32, #tpu.memory_space<vmem>>, vector<32x4xf32>
    tpu.vector_store %arg8[%c0_18, %c0_19], %26 {strides = array<i32>} : memref<32x4xf32, #tpu.memory_space<vmem>>, vector<32x4xf32>,
    return
  }
  func.func @transform_0(%arg0: i32) -> (i32, i32) {
    %c0_i32 = arith.constant 0 : i32
    %c0_i32_0 = arith.constant 0 : i32
    return %arg0, %c0_i32 : i32, i32
  }
  func.func @transform_1(%arg0: i32) -> (i32, i32) {
    %c0_i32 = arith.constant 0 : i32
    %c0_i32_0 = arith.constant 0 : i32
    %c0_i32_1 = arith.constant 0 : i32
    return %c0_i32, %c0_i32_0 : i32, i32
  }
  func.func @transform_2(%arg0: i32) -> (i32, i32) {
    %c0_i32 = arith.constant 0 : i32
    %c0_i32_0 = arith.constant 0 : i32
    %c0_i32_1 = arith.constant 0 : i32
    return %c0_i32, %c0_i32_0 : i32, i32
  }
  func.func @transform_3(%arg0: i32) -> (i32, i32) {
    %c0_i32 = arith.constant 0 : i32
    %c0_i32_0 = arith.constant 0 : i32
    %c0_i32_1 = arith.constant 0 : i32
    return %c0_i32, %c0_i32_0 : i32, i32
  }
  func.func @transform_4(%arg0: i32) -> (i32, i32) {
    %c0_i32 = arith.constant 0 : i32
    %c0_i32_0 = arith.constant 0 : i32
    %c0_i32_1 = arith.constant 0 : i32
    return %c0_i32, %c0_i32_0 : i32, i32
  }
  func.func @transform_5(%arg0: i32) -> (i32, i32) {
    %c0_i32 = arith.constant 0 : i32
    %c0_i32_0 = arith.constant 0 : i32
    %c0_i32_1 = arith.constant 0 : i32
    return %c0_i32, %c0_i32_0 : i32, i32
  }
  func.func @transform_6(%arg0: i32) -> (i32, i32) {
    %c0_i32 = arith.constant 0 : i32
    %c0_i32_0 = arith.constant 0 : i32
    %c0_i32_1 = arith.constant 0 : i32
    return %c0_i32, %c0_i32_0 : i32, i32
  }
  func.func @transform_7(%arg0: i32) -> (i32, i32) {
    %c0_i32 = arith.constant 0 : i32
    %c0_i32_0 = arith.constant 0 : i32
    return %arg0, %c0_i32 : i32, i32
  }
}

</mosaic_0001>

<bundles_post_ra>
// kernel: tpu_custom_call.1
= control target key start
LH: loop header
LB: loop body
LE: loop exit
PB: predicated region body
PF: predicated region fallthrough
CT: control target
= control target key end

     0   :  { %vm48_vm0 = vcmask 130048   ;;  %vm372_vm1 = vcmask 31744   ;;  %s629_s1 = inlined_call_operand.vmem [shape: bf16[16,128], index: 1, kind: input, shape index: {}]   ;;  %s630_s0 = inlined_call_operand.vmem [shape: f32[32,16], index: 0, kind: input, shape index: {}]   ;;  %s631_s3 = inlined_call_operand.vmem [shape: bf16[128,128], index: 3, kind: input, shape index: {}]   ;;  %s632_s5 = inlined_call_operand.vmem [shape: bf16[128,4], index: 5, kind: input, shape index: {}]   ;;  %s633_s2 = inlined_call_operand.vmem [shape: f32[1,128], index: 2, kind: input, shape index: {}]   ;;  %s634_s4 = inlined_call_operand.vmem [shape: f32[1,128], index: 4, kind: input, shape index: {}]   ;;  %s635_s6 = inlined_call_operand.vmem [shape: f32[1,4], index: 6, kind: input, shape index: {}]   ;;  %s636_s7 = inlined_call_operand.vmem [shape: f32[32,4], index: 7, kind: output, shape index: {}]  }
   0x1   :  { %v472_v0 = vld [vmem:[%s629_s1] sm:$0xff]   ;;  %v28_v2 = vld [vmem:[%s630_s0 + $0x8] sm:$0xff]  ;;  %v29_v3 = vld [vmem:[%s630_s0 + $0x10] sm:$0xff] }
   0x2   :  { %v27_v1 = vld [vmem:[%s630_s0] sm:$0xff]  ;;  %426 = vmatprep.subr.bf16.mxu0 %v472_v0  ;;  %v30_v5 = vld [vmem:[%s630_s0 + $0x18] sm:$0xff]  ;;  %v474_v8 = vld [vmem:[%s631_s3 + $0x8] sm:$0xff]  }
   0x3   :  { %v31_v4 = vpack.c.bf16 %v28_v2, %v27_v1  ;;  %427 = vmatpush3.bf16.msra.mxu0 %v472_v0  ;;  %v32_v6 = vpack.c.bf16 %v30_v5, %v29_v3  ;;  %v473_v7 = vld [vmem:[%s631_s3] sm:$0xff]   ;;  %v475_v9 = vld [vmem:[%s631_s3 + $0x10] sm:$0xff]   ;;  %v476_v10 = vld [vmem:[%s631_s3 + $0x18] sm:$0xff]  }
   0x4   :  { %432 = vmatprep.subr.bf16.mxu1 %v473_v7  ;;  %v477_v11 = vld [vmem:[%s631_s3 + $0x20] sm:$0xff]   ;;  %v478_v12 = vld [vmem:[%s631_s3 + $0x28] sm:$0xff]   ;;  %v479_v13 = vld [vmem:[%s631_s3 + $0x30] sm:$0xff]  }
   0x5   :  { %428 = vmatprep.mubr.msk.bf16.mxu0 %vm48_vm0, %v31_v4  ;;  %433 = vmatpush3.bf16.msra.mxu1 %v473_v7  ;;  %v480_v14 = vld [vmem:[%s631_s3 + $0x38] sm:$0xff]   ;;  %v481_v15 = vld [vmem:[%s632_s5] sm:$0xff]   ;;  %v482_v16 = vld [vmem:[%s632_s5 + $0x8] sm:$0xff]  }
   0x6   :  { %429 = vmatmul.mubr.msk.bf16.vlgmr.msra.gmra.mrb[0].mxu0 %vm48_vm0, %v32_v6  ;;  %434 = vmatprep.subr.bf16.mxu1 %v474_v8  ;;  %v483_v17 = vld [vmem:[%s632_s5 + $0x10] sm:$0xff]   ;;  %v484_v18 = vld [vmem:[%s632_s5 + $0x18] sm:$0xff]   ;;  %v485_v19 = vld [vmem:[%s632_s5 + $0x20] sm:$0xff]  }
   0x7   :  { %452 = vmatprep.subr.bf16.mxu0 %v481_v15  ;;  %v486_v20 = vld [vmem:[%s632_s5 + $0x28] sm:$0xff]   ;;  %v381_v21 = vld [vmem:[%s633_s2] ss:$0 sm:$0xff]  ;;  %v487_v52 = vld [vmem:[%s632_s5 + $0x30] sm:$0xff]  }
   0x8   :  { %453 = vmatpush3.bf16.msra.mxu0 %v481_v15  ;;  %v488_v53 = vld [vmem:[%s632_s5 + $0x38] sm:$0xff]   ;;  %v385_v54 = vld [vmem:[%s634_s4] ss:$0 sm:$0xff] }
   0x9   :  { %435 = vmatpush3.bf16.msra.mxu1 %v474_v8  ;;  %454 = vmatprep.subr.bf16.mxu0 %v482_v16  ;;  %v394_v5 = vld [vmem:[%s635_s6] ss:$0 sm:$0xff] }
   0xa   :  { %436 = vmatprep.subr.bf16.mxu1 %v475_v9 }
   0xc   :  { %455 = vmatpush3.bf16.msra.mxu0 %v482_v16 }
   0xd   :  { %437 = vmatpush3.bf16.msra.mxu1 %v475_v9  ;;  %456 = vmatprep.subr.bf16.mxu0 %v483_v17 }
   0xe   :  { %438 = vmatprep.subr.bf16.mxu1 %v476_v10 }
  0x10   :  { %457 = vmatpush3.bf16.msra.mxu0 %v483_v17 }
  0x11   :  { %439 = vmatpush3.bf16.msra.mxu1 %v476_v10  ;;  %458 = vmatprep.subr.bf16.mxu0 %v484_v18 }
  0x12   :  { %440 = vmatprep.subr.bf16.mxu1 %v477_v11 }
  0x14   :  { %459 = vmatpush3.bf16.msra.mxu0 %v484_v18 }
  0x15   :  { %441 = vmatpush3.bf16.msra.mxu1 %v477_v11  ;;  %460 = vmatprep.subr.bf16.mxu0 %v485_v19 }
  0x16   :  { %442 = vmatprep.subr.bf16.mxu1 %v478_v12 }
  0x18   :  { %461 = vmatpush3.bf16.msra.mxu0 %v485_v19 }
  0x19   :  { %443 = vmatpush3.bf16.msra.mxu1 %v478_v12  ;;  %462 = vmatprep.subr.bf16.mxu0 %v486_v20 }
  0x1a   :  { %444 = vmatprep.subr.bf16.mxu1 %v479_v13 }
  0x1c   :  { %463 = vmatpush3.bf16.msra.mxu0 %v486_v20 }
  0x1d   :  { %445 = vmatpush3.bf16.msra.mxu1 %v479_v13  ;;  %464 = vmatprep.subr.bf16.mxu0 %v487_v52 }
  0x1e   :  { %446 = vmatprep.subr.bf16.mxu1 %v480_v14 }
  0x20   :  { %465 = vmatpush3.bf16.msra.mxu0 %v487_v52 }
  0x21   :  { %447 = vmatpush3.bf16.msra.mxu1 %v480_v14  ;;  %466 = vmatprep.subr.bf16.mxu0 %v488_v53 }
  0x24   :  { %467 = vmatpush3.bf16.msra.mxu0 %v488_v53 }
  0xd9   :  { %v430_v22 = vpop.f32.mrb[0].mxu0 }
  0xda   :  { %v98_v23 = vadd.f32 %v430_v22, %v381_v21  ;;  %v89_v24 = vpop.f32.mrb[1].mxu0 }
  0xdb   :  { %v90_v25 = vadd.f32 %v381_v21, %v89_v24  ;;  %v431_v26 = vpop.f32.mrb[2].mxu0 }
  0xdc   :  { %v106_v27 = vsub.f32 0.0, %v98_v23  ;;  %v101_v28 = vadd.f32 %v431_v26, %v381_v21  ;;  %v92_v29 = vpop.f32.mrb[3].mxu0 }
  0xdd   :  { %v104_v30 = vsub.f32 0.0, %v90_v25  ;;  %v93_v31 = vadd.f32 %v381_v21, %v92_v29 }
  0xde   :  { %v112_v32 = vmul.f32 1.442695, %v106_v27  ;;  %v107_v33 = vsub.f32 0.0, %v101_v28 }
  0xdf   :  { %v108_v34 = vmul.f32 1.442695, %v104_v30  ;;  %v105_v35 = vsub.f32 0.0, %v93_v31 }
  0xe0   :  { %489 = vpow2.f32 %v112_v32  ;;  %v114_v36 = vmul.f32 1.442695, %v107_v33 }
  0xe1   :  { %491 = vpow2.f32 %v108_v34  ;;  %v110_v37 = vmul.f32 1.442695, %v105_v35 }
  0xe2   :  { %493 = vpow2.f32 %v114_v36 }
  0xe3   :  { %495 = vpow2.f32 %v110_v37 }
  0xea   :  { %v490_v38 = vpop.eup %489 }
  0xeb   :  { %v492_v39 = vpop.eup %491  ;;  %v118_v40 = vadd.f32 1.0, %v490_v38 }
  0xec   :  { %v494_v41 = vpop.eup %493  ;;  %v116_v42 = vadd.f32 1.0, %v492_v39 }
  0xed   :  { %v496_v43 = vpop.eup %495  ;;  %497 = vrcp.f32 %v118_v40  ;;  %v119_v44 = vadd.f32 1.0, %v494_v41 }
  0xee   :  { %499 = vrcp.f32 %v116_v42  ;;  %v117_v45 = vadd.f32 1.0, %v496_v43 }
  0xef   :  { %501 = vrcp.f32 %v119_v44 }
  0xf0   :  { %503 = vrcp.f32 %v117_v45 }
  0xf7   :  { %v498_v46 = vpop.eup %497 }
  0xf8   :  { %v500_v47 = vpop.eup %499 }
  0xf9   :  { %v502_v48 = vpop.eup %501 }
  0xfa   :  { %v504_v49 = vpop.eup %503  ;;  %v125_v50 = vpack.c.bf16 %v502_v48, %v498_v46 }
  0xfb   :  { %v124_v51 = vpack.c.bf16 %v504_v49, %v500_v47 }
  0xfd   :  { %448 = vmatprep.mubr.bf16.mxu1 %v124_v51 }
  0xfe   :  { %449 = vmatmul.mubr.bf16.vlgmr.msra.gmra.mrb[0].mxu1 %v125_v50 }
 0x1d1   :  { %v450_v55 = vpop.f32.mrb[0].mxu1 }
 0x1d2   :  { %v240_v56 = vadd.f32 %v450_v55, %v385_v54  ;;  %v231_v57 = vpop.f32.mrb[1].mxu1 }
 0x1d3   :  { %v232_v58 = vadd.f32 %v385_v54, %v231_v57  ;;  %v451_v59 = vpop.f32.mrb[2].mxu1 }
 0x1d4   :  { %v243_v60 = vadd.f32 %v451_v59, %v385_v54  ;;  %v234_v61 = vpop.f32.mrb[3].mxu1  ;;  %v248_v63 = vmax.f32 %v240_v56, 0.0 }
 0x1d5   :  { %v235_v62 = vadd.f32 %v385_v54, %v234_v61  ;;  %v246_v1 = vmax.f32 %v232_v58, 0.0 }
 0x1d6   :  { %v249_v0 = vmax.f32 %v243_v60, 0.0 }
 0x1d7   :  { %v247_v2 = vmax.f32 %v235_v62, 0.0 }
 0x1d8   :  { %v251_v3 = vpack.c.bf16 %v249_v0, %v248_v63 }
 0x1d9   :  { %v250_v4 = vpack.c.bf16 %v247_v2, %v246_v1 }
 0x1db   :  { %468 = vmatprep.mubr.bf16.mxu0 %v250_v4 }
 0x1dc   :  { %469 = vmatmul.mubr.bf16.vlgmr.msra.gmra.mrb[4].mxu0 %v251_v3 }
 0x2af   :  { %v470_v6 = vpop.f32.mrb[4].mxu0 }
 0x2b0   :  { %v366_v7 = vadd.f32 %v470_v6, %v394_v5  ;;  %v357_v8 = vpop.f32.mrb[5].mxu0 }
 0x2b1   :  { %v358_v9 = vadd.f32 %v394_v5, %v357_v8  ;;  %v471_v10 = vpop.f32.mrb[6].mxu0 }
 0x2b2   :  { %375 = vst.msk [vmem:[%s636_s7 + $0x10] sm:$0xff] %vm372_vm1, %v366_v7  ;;  %v369_v11 = vadd.f32 %v471_v10, %v394_v5  ;;  %v360_v12 = vpop.f32.mrb[7].mxu0 }
 0x2b3   :  { %373 = vst.msk [vmem:[%s636_s7] sm:$0xff] %vm372_vm1, %v358_v9  ;;  %v361_v13 = vadd.f32 %v394_v5, %v360_v12 }
 0x2b4   :  { %376 = vst.msk [vmem:[%s636_s7 + $0x18] sm:$0xff] %vm372_vm1, %v369_v11 }
 0x2b5   :  { %374 = vst.msk [vmem:[%s636_s7 + $0x8] sm:$0xff] %vm372_vm1, %v361_v13 }

</bundles_post_ra>
